<compile_context>
chip_gen: v5e
topology: v5e:2x2
jax: 0.10.0
libtpu: 0.0.40
codegen_flags: <defaults>
</compile_context>

<pallas_src>
import jax
import jax.numpy as jnp
from jax.experimental import pallas as pl
from jax.experimental.pallas import tpu as pltpu

_LANES = 128


def _tpu_generation() -> int:
    """Best-effort TPU generation (5, 6, 7, ...). 0 if unknown."""
    try:
        kind = jax.devices()[0].device_kind.lower()
    except Exception:
        return 0
    for gen in (7, 6, 5, 4, 3, 2):
        if f"v{gen}" in kind or f"tpu{gen}" in kind or f"{gen}x" in kind:
            return gen
    return 0


def _vmem_capacity_bytes():
    """Reported VMEM capacity, or None if the query is unavailable."""
    try:
        return int(pltpu.get_tpu_info().vmem_capacity_bytes)
    except Exception:
        return None


def _block_config(gen: int):
    """(target block bytes, min grid steps, vmem_limit_bytes or None)."""
    vmem_cap = _vmem_capacity_bytes()
    if gen >= 7:
        # v7x: ~3.2 TB/s per TC makes 2 MiB steps overhead-heavy; 6 MiB blocks
        # cut per-step overhead to <7%. 4 buffers x 6 MiB = 24 MiB, so raise
        # the scoped VMEM limit for headroom (64 MiB physical on v7x).
        # 2 TensorCores -> aim for >= 2 grid steps per core.
        target, min_steps, vmem_limit = 6 * 1024 * 1024, 4, 48 << 20
    elif gen == 6:
        # v6e: 4 x 4 MiB = 16 MiB fits the 32 MiB default scoped limit.
        target, min_steps, vmem_limit = 4 * 1024 * 1024, 2, None
    else:
        # v5e / unknown: 2 MiB blocks are already ~93% of the ~0.82 TB/s
        # roofline and stay well inside the 16 MiB scoped-VMEM default.
        target, min_steps, vmem_limit = 2 * 1024 * 1024, 2, None
    if vmem_cap:
        # Keep in/out double-buffer footprint (4 x block) well under capacity.
        target = min(target, vmem_cap // 8)
    return target, min_steps, vmem_limit


def _compute_dtype(x_dtype, gen: int):
    # v6e/v7x have bf16 VPU + EUP: keep bf16 math there (halves vreg
    # pressure). v5e and all other dtypes compute in f32.
    if gen >= 6 and jnp.dtype(x_dtype) == jnp.dtype(jnp.bfloat16):
        return jnp.bfloat16
    return jnp.float32


def _make_swish_kernel(beta: float, compute_dtype):
    beta_half = 0.5 * float(beta)

    def kernel(x_ref, o_ref):
        x = x_ref[...].astype(compute_dtype)
        # sigmoid(b*x) == 0.5 * (tanh(0.5*b*x) + 1): a single EUP
        # transcendental instead of exp + divide.
        sig = 0.5 * (jnp.tanh(beta_half * x) + 1.0)
        o_ref[...] = (x * sig).astype(o_ref.dtype)

    return kernel


def _pick_tm(rows: int, itemsize: int, target_bytes: int, min_steps: int) -> int:
    """Row-block size: ~target_bytes, multiple of 32 sublanes, >= min_steps grid steps."""
    if rows <= 32:
        # Tiny input: one block equal to the full array dims (constraint waived).
        return rows
    tm_target = max(32, target_bytes // (_LANES * itemsize))
    per_step = -(-rows // min_steps)      # ceil(rows / min_steps)
    tm = min(tm_target, per_step)
    tm = max(32, (tm // 32) * 32)         # multiple of 32 covers f32 / bf16 / int8 minimums
    return tm


def swish(x: jax.Array, beta: float = 1.0) -> jax.Array:
    """Swish / SiLU: x * sigmoid(beta * x). Works for any input shape/dtype."""
    orig_shape = x.shape
    orig_dtype = x.dtype
    n = x.size
    if n == 0:
        return x

    gen = _tpu_generation()
    target_bytes, min_steps, vmem_limit = _block_config(gen)
    compute_dtype = _compute_dtype(orig_dtype, gen)

    flat = x.reshape(-1)
    tail = n % _LANES
    n_main = n - tail

    if n_main == 0:
        # Fewer than 128 elements: a kernel launch is pure overhead.
        xf = flat.astype(compute_dtype)
        out = (xf * jax.nn.sigmoid(beta * xf)).astype(orig_dtype)
        return out.reshape(orig_shape)

    rows = n_main // _LANES
    x2d = flat[:n_main].reshape(rows, _LANES)

    tm = _pick_tm(rows, jnp.dtype(orig_dtype).itemsize, target_bytes, min_steps)
    grid = -(-rows // tm)  # ragged final block is fine for an elementwise op

    out2d = pl.pallas_call(
        _make_swish_kernel(beta, compute_dtype),
        out_shape=jax.ShapeDtypeStruct((rows, _LANES), orig_dtype),
        grid=(grid,),
        in_specs=[pl.BlockSpec((tm, _LANES), lambda i: (i, 0))],
        out_specs=pl.BlockSpec((tm, _LANES), lambda i: (i, 0)),
        compiler_params=pltpu.CompilerParams(
            dimension_semantics=("parallel",),
            vmem_limit_bytes=vmem_limit,
        ),
    )(x2d)

    out_flat = out2d.reshape(-1)
    if tail:
        # Handle the <128-element ragged tail in plain JAX instead of padding
        # the whole array (avoids pad + trailing-slice full-array copies).
        xt = flat[n_main:].astype(compute_dtype)
        tail_out = (xt * jax.nn.sigmoid(beta * xt)).astype(orig_dtype)
        out_flat = jnp.concatenate([out_flat, tail_out])
    return out_flat.reshape(orig_shape)


if __name__ == "__main__":
    key = jax.random.PRNGKey(0)
    beta = 1.0

    # Primary check: NCHW input, same convention as the PyTorch module.
    x = jax.random.normal(key, (2, 4, 16, 16), dtype=jnp.float32)
    y = jax.block_until_ready(swish(x, beta=beta))
    y_ref = x * jax.nn.sigmoid(beta * x)
    assert y.shape == x.shape and y.dtype == x.dtype
    assert jnp.allclose(y, y_ref, atol=1e-6, rtol=1e-6)

    # Lane-misaligned input: exercises the prefix-kernel + plain-JAX tail path.
    x2 = jax.random.normal(jax.random.PRNGKey(1), (3, 5, 13), dtype=jnp.float32)
    y2 = jax.block_until_ready(swish(x2, beta=beta))
    y2_ref = x2 * jax.nn.sigmoid(beta * x2)
    assert y2.shape == x2.shape and y2.dtype == x2.dtype
    assert jnp.allclose(y2, y2_ref, atol=1e-6, rtol=1e-6)

    print("KERNEL_OK")
</pallas_src>

<mosaic_0001>
module attributes {stable_mosaic.version = 11 : i64} {
  func.func @kernel(%arg0: i32, %arg1: memref<16x128xf32, #tpu.memory_space<vmem>>, %arg2: memref<16x128xf32, #tpu.memory_space<vmem>>) attributes {dimension_semantics = [#tpu.dimension_semantics<parallel>], iteration_bounds = array<i64: 1>, scalar_prefetch = 0 : i64, scratch_operands = 0 : i64, tpu.core_type = #tpu.core_type<tc>, window_params = [{transform_indices = @transform_0, window_bounds = array<i64: 16, 128>}, {transform_indices = @transform_1, window_bounds = array<i64: 16, 128>}]} {
    %c0 = arith.constant 0 : index
    %c0_0 = arith.constant 0 : index
    %0 = vector.load %arg1[%c0, %c0_0] : memref<16x128xf32, #tpu.memory_space<vmem>>, vector<16x128xf32>
    %cst = arith.constant 5.000000e-01 : f32
    %1 = vector.broadcast %cst : f32 to vector<16x128xf32>
    %2 = arith.mulf %1, %0 : vector<16x128xf32>
    %3 = math.tanh %2 : vector<16x128xf32>
    %cst_1 = arith.constant 1.000000e+00 : f32
    %4 = vector.broadcast %cst_1 : f32 to vector<16x128xf32>
    %5 = arith.addf %3, %4 : vector<16x128xf32>
    %cst_2 = arith.constant 5.000000e-01 : f32
    %6 = vector.broadcast %cst_2 : f32 to vector<16x128xf32>
    %7 = arith.mulf %6, %5 : vector<16x128xf32>
    %8 = arith.mulf %0, %7 : vector<16x128xf32>
    %c0_3 = arith.constant 0 : index
    %c0_4 = arith.constant 0 : index
    %9 = vector.load %arg2[%c0_3, %c0_4] : memref<16x128xf32, #tpu.memory_space<vmem>>, vector<16x128xf32>
    tpu.vector_store %arg2[%c0_3, %c0_4], %8 {strides = array<i32>} : memref<16x128xf32, #tpu.memory_space<vmem>>, vector<16x128xf32>,
    return
  }
  func.func @transform_0(%arg0: i32) -> (i32, i32) {
    %c0_i32 = arith.constant 0 : i32
    %c0_i32_0 = arith.constant 0 : i32
    return %arg0, %c0_i32 : i32, i32
  }
  func.func @transform_1(%arg0: i32) -> (i32, i32) {
    %c0_i32 = arith.constant 0 : i32
    %c0_i32_0 = arith.constant 0 : i32
    return %arg0, %c0_i32 : i32, i32
  }
}

</mosaic_0001>

<bundles_post_ra>
// kernel: tpu_custom_call.1
= control target key start
LH: loop header
LB: loop body
LE: loop exit
PB: predicated region body
PF: predicated region fallthrough
CT: control target
= control target key end

     0   :  { %6 = vsyncpa [#allocation3], 0  ;;  %s138_s0 = inlined_call_operand.hbm [shape: f32[16,128], index: 0, kind: input, shape index: {}]   ;;  %s139_s1 = inlined_call_operand.hbm [shape: f32[16,128], index: 1, kind: output, shape index: {}]  }
   0x1   :  { %7 = vsyncpa [#allocation4], 0  ;;  %s12_s8 = sshll.u32 %s138_s0, 4  ;;  %s118_s9 = smov [#allocation2]   ;;  %s13_s8 = int_to_ptr.hbm [resolvable:$true] %s12_s8 }
   0x2   :  { %s14_s10 = sshll.u32 %s118_s9, 4  ;;  %s119_s11 = smov 128   ;;  %s15_s10 = int_to_ptr.vmem [resolvable:$true] %s14_s10 }
   0x3   :  { %s120_s12 = smov 8  }
   0x4   :  { %20 = dma.hbm_to_vmem [thread:$0]  %s13_s8, 256, %s15_s10, [#allocation3], %s119_s11, %s119_s11, %s120_s12  }
   0x5   :  { %114 = dma.done.wait [#allocation3], 256  }
   0x6   :  { %115 = vsyncadd [#allocation3], 4294967040  ;;  %v25_v0 = vld [vmem:[#allocation2] sm:$0xff]  ;;  %v26_v1 = vld [vmem:[#allocation2 + $0x8] sm:$0xff]  ;;  %s121_s0 = smov [#allocation5]   ;;  %s45_s16 = sshll.u32 %s139_s1, 4  ;;  %s46_s16 = int_to_ptr.hbm [resolvable:$true] %s45_s16 }
   0x7   :  { %v27_v2 = vmul.f32 0.5, %v25_v0  ;;  %v28_v3 = vmul.f32 0.5, %v26_v1  ;;  %s43_s13 = sshll.u32 %s121_s0, 4  ;;  %s44_s13 = int_to_ptr.vmem [resolvable:$true] %s43_s13 }
   0x9   :  { %62 = vtanh.f32 %v27_v2 }
   0xa   :  { %64 = vtanh.f32 %v28_v3 }
   0xf   :  { %v63_v4 = vpop.eup %62 }
  0x10   :  { %v65_v5 = vpop.eup %64  ;;  %v31_v6 = vadd.f32 1.0, %v63_v4 }
  0x11   :  { %v32_v7 = vadd.f32 1.0, %v65_v5 }
  0x12   :  { %v33_v8 = vmul.f32 0.5, %v31_v6 }
  0x13   :  { %v34_v9 = vmul.f32 0.5, %v32_v7 }
  0x14   :  { %v35_v10 = vmul.f32 %v33_v8, %v25_v0 }
  0x15   :  { %v36_v11 = vmul.f32 %v34_v9, %v26_v1 }
  0x16   :  { %37 = vst [vmem:[#allocation5] sm:$0xff] %v35_v10 }
  0x17   :  { %38 = vst [vmem:[#allocation5 + $0x8] sm:$0xff] %v36_v11 }
  0x18   :  { %51 = dma.vmem_to_hbm [thread:$0]  %s44_s13, 256, %s46_s16, [#allocation4], %s119_s11, %s119_s11, %s120_s12  }
  0x19   :  { %116 = dma.done.wait [#allocation4], 256  }
  0x1a   :  { %117 = vsyncadd [#allocation4], 4294967040 }
  0x1b   :  { %56 = vsyncpa [#allocation3], 1 }
  0x1c   :  { %57 = vsyncpa [#allocation4], 1 }

</bundles_post_ra>
